<compile_context>
chip_gen: v5e
topology: v5e:2x2
jax: 0.10.0
libtpu: 0.0.40
codegen_flags: <defaults>
</compile_context>

<pallas_src>
import functools

import jax
import jax.numpy as jnp
from jax.experimental import pallas as pl
from jax.experimental.pallas import tpu as pltpu

EPS = 1e-5


def _conv_in_relu_kernel(x_ref, w_ref, gb_ref, mask_ref, out_ref, *, K, Wp, hw):
    # x_ref:    (1, Cin, LP)      zero-padded, (H,W)-flattened input row for one sample
    # w_ref:    (K*K, Cout, Cin)  per-tap weight matrices, tap index t = ki*K + kj
    # gb_ref:   (Cout, 2)         [:, 0] = gamma, [:, 1] = beta (f32)
    # mask_ref: (1, OP)           1.0 where the flattened position is a real output pixel
    # out_ref:  (1, Cout, OP)     OP = H_out * Wp (width-padding columns hold garbage,
    #                             cropped by the wrapper)
    op = out_ref.shape[2]
    cout = out_ref.shape[1]

    x = x_ref[0]                                                  # (Cin, LP), compute dtype

    # Convolution: K*K shifted lane-slices, each a small MXU matmul, f32 accumulation.
    # For flattened output position j = h*Wp + w (w < W_out), the tap (ki, kj) reads
    # x_flat[c, ki*Wp + kj + j] == x_pad[c, h+ki, w+kj]  -> exactly the conv window.
    acc = jnp.zeros((cout, op), dtype=jnp.float32)
    for ki in range(K):
        for kj in range(K):
            start = ki * Wp + kj                                  # static offset
            xs = x[:, start:start + op]                           # (Cin, OP)
            wk = w_ref[ki * K + kj]                               # (Cout, Cin)
            acc = acc + jnp.dot(wk, xs, preferred_element_type=jnp.float32)

    # InstanceNorm2d (training-mode, biased variance), single-pass masked stats in f32.
    mask = mask_ref[...]                                          # (1, OP) f32
    inv_hw = jnp.float32(1.0 / hw)
    mean = jnp.sum(acc * mask, axis=1, keepdims=True) * inv_hw    # (Cout, 1)
    mean_sq = jnp.sum(acc * acc * mask, axis=1, keepdims=True) * inv_hw
    var = mean_sq - mean * mean

    gamma = gb_ref[:, 0:1]                                        # (Cout, 1) f32
    beta = gb_ref[:, 1:2]                                         # (Cout, 1) f32
    scale = gamma * jax.lax.rsqrt(var + EPS)                      # folded affine
    shift = beta - mean * scale

    out_ref[0] = jnp.maximum(acc * scale + shift, 0.0).astype(out_ref.dtype)


def base_conv_block(x_nchw, weight, gamma, beta, *, kernel_size=3, stride=1,
                    padding=None, compute_dtype=jnp.bfloat16):
    """Conv2d(bias=False) -> InstanceNorm2d(affine) -> ReLU.

    x_nchw: (N, Cin, H, W)   weight: (Cout, Cin, K, K)   gamma, beta: (Cout,)
    Returns: (N, Cout, H_out, W_out)
    """
    if padding is None:
        padding = (kernel_size - 1) // 2
    assert stride == 1, "this synthetic kernel instantiates stride=1"

    N, Cin, H, W = x_nchw.shape
    Cout = weight.shape[0]
    K = kernel_size
    Hp = H + 2 * padding
    Wp = W + 2 * padding
    H_out = Hp - K + 1
    W_out = Wp - K + 1
    HW = H_out * W_out                      # number of valid output pixels per (n, c)
    OP = H_out * Wp                         # lane extent of the padded flattened output

    # --- glue (cheap, no im2col): zero-pad spatially, flatten (Hp, Wp) into one lane axis,
    #     and pad that axis so the largest shifted slice stays in bounds & lanes are x128.
    max_start = (K - 1) * Wp + (K - 1)
    LP = ((max_start + OP + 127) // 128) * 128
    x_pad = jnp.pad(x_nchw, ((0, 0), (0, 0), (padding, padding), (padding, padding)))
    x_flat = x_pad.reshape(N, Cin, Hp * Wp)
    x_flat = jnp.pad(x_flat, ((0, 0), (0, 0), (0, LP - Hp * Wp))).astype(compute_dtype)

    # Per-tap weights (K*K, Cout, Cin); tap order matches the kernel's ki*K + kj indexing.
    w_taps = jnp.transpose(weight, (2, 3, 0, 1)).reshape(K * K, Cout, Cin)
    w_taps = w_taps.astype(compute_dtype)

    # gamma/beta folded into one tiny block; stats/epilogue stay f32 (v5e has no bf16 VPU).
    gb = jnp.stack([gamma, beta], axis=1).astype(jnp.float32)     # (Cout, 2)

    # Valid-pixel mask over the padded flattened output positions (1 where w < W_out).
    mask = (jnp.arange(OP) % Wp < W_out).astype(jnp.float32).reshape(1, OP)

    kernel = functools.partial(_conv_in_relu_kernel, K=K, Wp=Wp, hw=HW)

    out = pl.pallas_call(
        kernel,
        out_shape=jax.ShapeDtypeStruct((N, Cout, OP), x_nchw.dtype),
        grid=(N,),                                                # one sample per step
        in_specs=[
            pl.BlockSpec((1, Cin, LP), lambda n: (n, 0, 0)),
            pl.BlockSpec((K * K, Cout, Cin), lambda n: (0, 0, 0)),
            pl.BlockSpec((Cout, 2), lambda n: (0, 0)),
            pl.BlockSpec((1, OP), lambda n: (0, 0)),
        ],
        out_specs=pl.BlockSpec((1, Cout, OP), lambda n: (n, 0, 0)),
        compiler_params=pltpu.CompilerParams(
            dimension_semantics=("parallel",)),                   # megacore split over N
    )(x_flat, w_taps, gb, mask)

    # (N, Cout, H_out*Wp) -> (N, Cout, H_out, Wp) is a free reshape; crop width padding.
    return out.reshape(N, Cout, H_out, Wp)[:, :, :, :W_out]


def _reference(x_nchw, weight, gamma, beta, padding=1):
    """Pure-JAX reference (lax conv + instance norm + relu) for sanity check."""
    y = jax.lax.conv_general_dilated(
        x_nchw.astype(jnp.float32), weight.astype(jnp.float32),
        window_strides=(1, 1), padding=[(padding, padding), (padding, padding)],
        dimension_numbers=("NCHW", "OIHW", "NCHW"))
    mean = jnp.mean(y, axis=(2, 3), keepdims=True)
    var = jnp.mean((y - mean) ** 2, axis=(2, 3), keepdims=True)
    xh = (y - mean) * jax.lax.rsqrt(var + EPS)
    out = gamma.reshape(1, -1, 1, 1) * xh + beta.reshape(1, -1, 1, 1)
    return jnp.maximum(out, 0.0)


if __name__ == "__main__":
    key = jax.random.PRNGKey(0)
    k_x, k_w, k_g, k_b = jax.random.split(key, 4)

    N, Cin, H, W = 2, 4, 16, 16
    Cout, K = 8, 3

    x = jax.random.normal(k_x, (N, Cin, H, W), dtype=jnp.float32)
    weight = jax.random.normal(k_w, (Cout, Cin, K, K), dtype=jnp.float32) * 0.1
    gamma = 1.0 + 0.1 * jax.random.normal(k_g, (Cout,), dtype=jnp.float32)
    beta = 0.05 * jax.random.normal(k_b, (Cout,), dtype=jnp.float32)

    ref = _reference(x, weight, gamma, beta, padding=1)

    # f32 matmul-input path: tight check.
    out_f32 = jax.block_until_ready(
        base_conv_block(x, weight, gamma, beta, kernel_size=K, stride=1,
                        compute_dtype=jnp.float32))
    assert out_f32.shape == (N, Cout, H, W), out_f32.shape
    assert jnp.allclose(out_f32, ref, atol=2e-4, rtol=2e-4), float(
        jnp.max(jnp.abs(out_f32 - ref)))

    # bf16 matmul-input default path (f32 accumulation & stats): loose check.
    out_bf16 = jax.block_until_ready(
        base_conv_block(x, weight, gamma, beta, kernel_size=K, stride=1))
    assert out_bf16.shape == (N, Cout, H, W), out_bf16.shape
    assert jnp.allclose(out_bf16, ref, atol=8e-2, rtol=5e-2), float(
        jnp.max(jnp.abs(out_bf16 - ref)))

    print("KERNEL_OK")
</pallas_src>

<mosaic_0001>
module attributes {stable_mosaic.version = 11 : i64} {
  func.func @_conv_in_relu_kernel(%arg0: i32, %arg1: memref<1x4x384xf32, #tpu.memory_space<vmem>>, %arg2: memref<9x8x4xf32, #tpu.memory_space<vmem>>, %arg3: memref<8x2xf32, #tpu.memory_space<vmem>>, %arg4: memref<1x288xf32, #tpu.memory_space<vmem>>, %arg5: memref<1x8x288xf32, #tpu.memory_space<vmem>>) attributes {dimension_semantics = [#tpu.dimension_semantics<parallel>], iteration_bounds = array<i64: 2>, scalar_prefetch = 0 : i64, scratch_operands = 0 : i64, tpu.core_type = #tpu.core_type<tc>, window_params = [{transform_indices = @transform_0, window_bounds = array<i64: 1, 4, 384>}, {pipeline_mode = #tpu.pipeline_mode<synchronous>, transform_indices = @transform_1, window_bounds = array<i64: 9, 8, 4>}, {pipeline_mode = #tpu.pipeline_mode<synchronous>, transform_indices = @transform_2, window_bounds = array<i64: 8, 2>}, {pipeline_mode = #tpu.pipeline_mode<synchronous>, transform_indices = @transform_3, window_bounds = array<i64: 1, 288>}, {transform_indices = @transform_4, window_bounds = array<i64: 1, 8, 288>}]} {
    %c0 = arith.constant 0 : index
    %c0_0 = arith.constant 0 : index
    %c0_1 = arith.constant 0 : index
    %0 = vector.load %arg1[%c0, %c0_0, %c0_1] : memref<1x4x384xf32, #tpu.memory_space<vmem>>, vector<1x4x384xf32>
    %1 = vector.shape_cast %0 : vector<1x4x384xf32> to vector<4x384xf32>
    %cst = arith.constant 0.000000e+00 : f32
    %2 = vector.broadcast %cst : f32 to vector<8x288xf32>
    %3 = vector.extract_strided_slice %1 {offsets = [0, 0], sizes = [4, 288], strides = [1, 1]} : vector<4x384xf32> to vector<4x288xf32>
    %c0_2 = arith.constant 0 : index
    %c0_3 = arith.constant 0 : index
    %c0_4 = arith.constant 0 : index
    %4 = vector.load %arg2[%c0_2, %c0_3, %c0_4] : memref<9x8x4xf32, #tpu.memory_space<vmem>>, vector<1x8x4xf32>
    %5 = vector.shape_cast %4 : vector<1x8x4xf32> to vector<8x4xf32>
    %cst_5 = arith.constant dense<0.000000e+00> : vector<8x288xf32>
    %6 = tpu.matmul %5, %3, %cst_5 {dimension_numbers = #tpu.dot_dimension_numbers<[1], [0], [0], [1], [0, 0, 1, 1], [], []>} : vector<8x4xf32>, vector<4x288xf32>, vector<8x288xf32> -> vector<8x288xf32>
    %7 = arith.addf %2, %6 : vector<8x288xf32>
    %8 = vector.extract_strided_slice %1 {offsets = [0, 1], sizes = [4, 288], strides = [1, 1]} : vector<4x384xf32> to vector<4x288xf32>
    %c1 = arith.constant 1 : index
    %c0_6 = arith.constant 0 : index
    %c0_7 = arith.constant 0 : index
    %9 = vector.load %arg2[%c1, %c0_6, %c0_7] : memref<9x8x4xf32, #tpu.memory_space<vmem>>, vector<1x8x4xf32>
    %10 = vector.shape_cast %9 : vector<1x8x4xf32> to vector<8x4xf32>
    %cst_8 = arith.constant dense<0.000000e+00> : vector<8x288xf32>
    %11 = tpu.matmul %10, %8, %cst_8 {dimension_numbers = #tpu.dot_dimension_numbers<[1], [0], [0], [1], [0, 0, 1, 1], [], []>} : vector<8x4xf32>, vector<4x288xf32>, vector<8x288xf32> -> vector<8x288xf32>
    %12 = arith.addf %7, %11 : vector<8x288xf32>
    %13 = vector.extract_strided_slice %1 {offsets = [0, 2], sizes = [4, 288], strides = [1, 1]} : vector<4x384xf32> to vector<4x288xf32>
    %c2 = arith.constant 2 : index
    %c0_9 = arith.constant 0 : index
    %c0_10 = arith.constant 0 : index
    %14 = vector.load %arg2[%c2, %c0_9, %c0_10] : memref<9x8x4xf32, #tpu.memory_space<vmem>>, vector<1x8x4xf32>
    %15 = vector.shape_cast %14 : vector<1x8x4xf32> to vector<8x4xf32>
    %cst_11 = arith.constant dense<0.000000e+00> : vector<8x288xf32>
    %16 = tpu.matmul %15, %13, %cst_11 {dimension_numbers = #tpu.dot_dimension_numbers<[1], [0], [0], [1], [0, 0, 1, 1], [], []>} : vector<8x4xf32>, vector<4x288xf32>, vector<8x288xf32> -> vector<8x288xf32>
    %17 = arith.addf %12, %16 : vector<8x288xf32>
    %18 = vector.extract_strided_slice %1 {offsets = [0, 18], sizes = [4, 288], strides = [1, 1]} : vector<4x384xf32> to vector<4x288xf32>
    %c3 = arith.constant 3 : index
    %c0_12 = arith.constant 0 : index
    %c0_13 = arith.constant 0 : index
    %19 = vector.load %arg2[%c3, %c0_12, %c0_13] : memref<9x8x4xf32, #tpu.memory_space<vmem>>, vector<1x8x4xf32>
    %20 = vector.shape_cast %19 : vector<1x8x4xf32> to vector<8x4xf32>
    %cst_14 = arith.constant dense<0.000000e+00> : vector<8x288xf32>
    %21 = tpu.matmul %20, %18, %cst_14 {dimension_numbers = #tpu.dot_dimension_numbers<[1], [0], [0], [1], [0, 0, 1, 1], [], []>} : vector<8x4xf32>, vector<4x288xf32>, vector<8x288xf32> -> vector<8x288xf32>
    %22 = arith.addf %17, %21 : vector<8x288xf32>
    %23 = vector.extract_strided_slice %1 {offsets = [0, 19], sizes = [4, 288], strides = [1, 1]} : vector<4x384xf32> to vector<4x288xf32>
    %c4 = arith.constant 4 : index
    %c0_15 = arith.constant 0 : index
    %c0_16 = arith.constant 0 : index
    %24 = vector.load %arg2[%c4, %c0_15, %c0_16] : memref<9x8x4xf32, #tpu.memory_space<vmem>>, vector<1x8x4xf32>
    %25 = vector.shape_cast %24 : vector<1x8x4xf32> to vector<8x4xf32>
    %cst_17 = arith.constant dense<0.000000e+00> : vector<8x288xf32>
    %26 = tpu.matmul %25, %23, %cst_17 {dimension_numbers = #tpu.dot_dimension_numbers<[1], [0], [0], [1], [0, 0, 1, 1], [], []>} : vector<8x4xf32>, vector<4x288xf32>, vector<8x288xf32> -> vector<8x288xf32>
    %27 = arith.addf %22, %26 : vector<8x288xf32>
    %28 = vector.extract_strided_slice %1 {offsets = [0, 20], sizes = [4, 288], strides = [1, 1]} : vector<4x384xf32> to vector<4x288xf32>
    %c5 = arith.constant 5 : index
    %c0_18 = arith.constant 0 : index
    %c0_19 = arith.constant 0 : index
    %29 = vector.load %arg2[%c5, %c0_18, %c0_19] : memref<9x8x4xf32, #tpu.memory_space<vmem>>, vector<1x8x4xf32>
    %30 = vector.shape_cast %29 : vector<1x8x4xf32> to vector<8x4xf32>
    %cst_20 = arith.constant dense<0.000000e+00> : vector<8x288xf32>
    %31 = tpu.matmul %30, %28, %cst_20 {dimension_numbers = #tpu.dot_dimension_numbers<[1], [0], [0], [1], [0, 0, 1, 1], [], []>} : vector<8x4xf32>, vector<4x288xf32>, vector<8x288xf32> -> vector<8x288xf32>
    %32 = arith.addf %27, %31 : vector<8x288xf32>
    %33 = vector.extract_strided_slice %1 {offsets = [0, 36], sizes = [4, 288], strides = [1, 1]} : vector<4x384xf32> to vector<4x288xf32>
    %c6 = arith.constant 6 : index
    %c0_21 = arith.constant 0 : index
    %c0_22 = arith.constant 0 : index
    %34 = vector.load %arg2[%c6, %c0_21, %c0_22] : memref<9x8x4xf32, #tpu.memory_space<vmem>>, vector<1x8x4xf32>
    %35 = vector.shape_cast %34 : vector<1x8x4xf32> to vector<8x4xf32>
    %cst_23 = arith.constant dense<0.000000e+00> : vector<8x288xf32>
    %36 = tpu.matmul %35, %33, %cst_23 {dimension_numbers = #tpu.dot_dimension_numbers<[1], [0], [0], [1], [0, 0, 1, 1], [], []>} : vector<8x4xf32>, vector<4x288xf32>, vector<8x288xf32> -> vector<8x288xf32>
    %37 = arith.addf %32, %36 : vector<8x288xf32>
    %38 = vector.extract_strided_slice %1 {offsets = [0, 37], sizes = [4, 288], strides = [1, 1]} : vector<4x384xf32> to vector<4x288xf32>
    %c7 = arith.constant 7 : index
    %c0_24 = arith.constant 0 : index
    %c0_25 = arith.constant 0 : index
    %39 = vector.load %arg2[%c7, %c0_24, %c0_25] : memref<9x8x4xf32, #tpu.memory_space<vmem>>, vector<1x8x4xf32>
    %40 = vector.shape_cast %39 : vector<1x8x4xf32> to vector<8x4xf32>
    %cst_26 = arith.constant dense<0.000000e+00> : vector<8x288xf32>
    %41 = tpu.matmul %40, %38, %cst_26 {dimension_numbers = #tpu.dot_dimension_numbers<[1], [0], [0], [1], [0, 0, 1, 1], [], []>} : vector<8x4xf32>, vector<4x288xf32>, vector<8x288xf32> -> vector<8x288xf32>
    %42 = arith.addf %37, %41 : vector<8x288xf32>
    %43 = vector.extract_strided_slice %1 {offsets = [0, 38], sizes = [4, 288], strides = [1, 1]} : vector<4x384xf32> to vector<4x288xf32>
    %c8 = arith.constant 8 : index
    %c0_27 = arith.constant 0 : index
    %c0_28 = arith.constant 0 : index
    %44 = vector.load %arg2[%c8, %c0_27, %c0_28] : memref<9x8x4xf32, #tpu.memory_space<vmem>>, vector<1x8x4xf32>
    %45 = vector.shape_cast %44 : vector<1x8x4xf32> to vector<8x4xf32>
    %cst_29 = arith.constant dense<0.000000e+00> : vector<8x288xf32>
    %46 = tpu.matmul %45, %43, %cst_29 {dimension_numbers = #tpu.dot_dimension_numbers<[1], [0], [0], [1], [0, 0, 1, 1], [], []>} : vector<8x4xf32>, vector<4x288xf32>, vector<8x288xf32> -> vector<8x288xf32>
    %47 = arith.addf %42, %46 : vector<8x288xf32>
    %c0_30 = arith.constant 0 : index
    %c0_31 = arith.constant 0 : index
    %48 = vector.load %arg4[%c0_30, %c0_31] : memref<1x288xf32, #tpu.memory_space<vmem>>, vector<1x288xf32>
    %49 = vector.broadcast %48 : vector<1x288xf32> to vector<8x288xf32>
    %50 = arith.mulf %47, %49 : vector<8x288xf32>
    %cst_32 = arith.constant dense<0.000000e+00> : vector<8xf32>
    %51 = vector.multi_reduction <add>, %50, %cst_32 [1] : vector<8x288xf32> to vector<8xf32>
    %52 = vector.shape_cast %51 : vector<8xf32> to vector<8x1xf32>
    %cst_33 = arith.constant 3.906250e-03 : f32
    %53 = vector.broadcast %cst_33 : f32 to vector<8x1xf32>
    %54 = arith.mulf %52, %53 : vector<8x1xf32>
    %55 = arith.mulf %47, %47 : vector<8x288xf32>
    %56 = vector.broadcast %48 : vector<1x288xf32> to vector<8x288xf32>
    %57 = arith.mulf %55, %56 : vector<8x288xf32>
    %cst_34 = arith.constant dense<0.000000e+00> : vector<8xf32>
    %58 = vector.multi_reduction <add>, %57, %cst_34 [1] : vector<8x288xf32> to vector<8xf32>
    %59 = vector.shape_cast %58 : vector<8xf32> to vector<8x1xf32>
    %cst_35 = arith.constant 3.906250e-03 : f32
    %60 = vector.broadcast %cst_35 : f32 to vector<8x1xf32>
    %61 = arith.mulf %59, %60 : vector<8x1xf32>
    %62 = arith.mulf %54, %54 : vector<8x1xf32>
    %63 = arith.subf %61, %62 : vector<8x1xf32>
    %c0_36 = arith.constant 0 : index
    %c0_37 = arith.constant 0 : index
    %64 = vector.load %arg3[%c0_36, %c0_37] : memref<8x2xf32, #tpu.memory_space<vmem>>, vector<8x1xf32>
    %c0_38 = arith.constant 0 : index
    %c1_39 = arith.constant 1 : index
    %65 = vector.load %arg3[%c0_38, %c1_39] : memref<8x2xf32, #tpu.memory_space<vmem>>, vector<8x1xf32>
    %cst_40 = arith.constant 9.99999974E-6 : f32
    %66 = vector.broadcast %cst_40 : f32 to vector<8x1xf32>
    %67 = arith.addf %63, %66 : vector<8x1xf32>
    %68 = math.rsqrt %67 : vector<8x1xf32>
    %69 = arith.mulf %64, %68 : vector<8x1xf32>
    %70 = arith.mulf %54, %69 : vector<8x1xf32>
    %71 = arith.subf %65, %70 : vector<8x1xf32>
    %72 = vector.broadcast %69 : vector<8x1xf32> to vector<8x288xf32>
    %73 = arith.mulf %47, %72 : vector<8x288xf32>
    %74 = vector.broadcast %71 : vector<8x1xf32> to vector<8x288xf32>
    %75 = arith.addf %73, %74 : vector<8x288xf32>
    %cst_41 = arith.constant 0.000000e+00 : f32
    %76 = vector.broadcast %cst_41 : f32 to vector<8x288xf32>
    %77 = arith.maximumf %75, %76 : vector<8x288xf32>
    %c0_42 = arith.constant 0 : index
    %c0_43 = arith.constant 0 : index
    %c0_44 = arith.constant 0 : index
    %78 = vector.load %arg5[%c0_42, %c0_43, %c0_44] : memref<1x8x288xf32, #tpu.memory_space<vmem>>, vector<1x8x288xf32>
    %79 = vector.shape_cast %78 : vector<1x8x288xf32> to vector<8x288xf32>
    %80 = vector.shape_cast %77 : vector<8x288xf32> to vector<1x8x288xf32>
    tpu.vector_store %arg5[%c0_42, %c0_43, %c0_44], %80 {strides = array<i32>} : memref<1x8x288xf32, #tpu.memory_space<vmem>>, vector<1x8x288xf32>,
    return
  }
  func.func @transform_0(%arg0: i32) -> (i32, i32, i32) {
    %c0_i32 = arith.constant 0 : i32
    %c0_i32_0 = arith.constant 0 : i32
    %c0_i32_1 = arith.constant 0 : i32
    return %arg0, %c0_i32, %c0_i32_0 : i32, i32, i32
  }
  func.func @transform_1(%arg0: i32) -> (i32, i32, i32) {
    %c0_i32 = arith.constant 0 : i32
    %c0_i32_0 = arith.constant 0 : i32
    %c0_i32_1 = arith.constant 0 : i32
    %c0_i32_2 = arith.constant 0 : i32
    return %c0_i32, %c0_i32_0, %c0_i32_1 : i32, i32, i32
  }
  func.func @transform_2(%arg0: i32) -> (i32, i32) {
    %c0_i32 = arith.constant 0 : i32
    %c0_i32_0 = arith.constant 0 : i32
    %c0_i32_1 = arith.constant 0 : i32
    return %c0_i32, %c0_i32_0 : i32, i32
  }
  func.func @transform_3(%arg0: i32) -> (i32, i32) {
    %c0_i32 = arith.constant 0 : i32
    %c0_i32_0 = arith.constant 0 : i32
    %c0_i32_1 = arith.constant 0 : i32
    return %c0_i32, %c0_i32_0 : i32, i32
  }
  func.func @transform_4(%arg0: i32) -> (i32, i32, i32) {
    %c0_i32 = arith.constant 0 : i32
    %c0_i32_0 = arith.constant 0 : i32
    %c0_i32_1 = arith.constant 0 : i32
    return %arg0, %c0_i32, %c0_i32_0 : i32, i32, i32
  }
}

</mosaic_0001>

<bundles_post_ra>
// kernel: tpu_custom_call.1
= control target key start
LH: loop header
LB: loop body
LE: loop exit
PB: predicated region body
PF: predicated region fallthrough
CT: control target
= control target key end

     0   :  { %9 = vsyncpa [#allocation3], 0  ;;  %s1575_s0 = inlined_call_operand.vmem [shape: f32[2,4,384], index: 0, kind: input, shape index: {}]   ;;  %s1576_s1 = inlined_call_operand.vmem [shape: f32[9,8,4], index: 1, kind: input, shape index: {}]   ;;  %s1577_s2 = inlined_call_operand.vmem [shape: f32[8,2], index: 2, kind: input, shape index: {}]   ;;  %s1578_s3 = inlined_call_operand.vmem [shape: f32[1,288], index: 3, kind: input, shape index: {}]   ;;  %s1579_s4 = inlined_call_operand.hbm [shape: f32[2,8,288], index: 4, kind: output, shape index: {}]  }
   0x1   :  { %11 = vsyncpa [#allocation3 + $0x1], 0  ;;  %s1364_s15 = smov 0   ;;  %s1366_s16 = smov 0  }
   0x2   :  { %s1368_s17 = smov 0   ;;  %s1370_s18 = smov 0  }
   0x3 LB: > { %s1385_s19 = sadd.s32 4294967295, %s1326_s18   ;;  %s1136_s20 = sadd.s32 4294967294, %s1326_s18   ;;  %s1326_s18 = sphi %s1370_s18, %s1585_s18   ;;  %s1322_s17 = sphi %s1368_s17, %s1584_s17   ;;  %s1318_s16 = sphi %s1366_s16, %s1583_s16   ;;  %s1314_s15 = sphi %s1364_s15, %s1582_s15  }
   0x4   : > { %s1389_s21 = sadd.s32 1, %s1326_s18   ;;  %s113_s22 = sadd.s32 1, %s1322_s17 }
   0x5   : > { %s110_s23 = ssub.s32 %s1326_s18, %s1389_s21  ;;  %p123_p0 = scmp.ne.s32.totalorder %s1322_s17, %s1318_s16 }
   0x6   : > { %p111_p1 = scmp.eq.s32.totalorder %s110_s23, 0  ;;  %p124_p2 = scmp.eq.s32.totalorder %s1385_s19, 1 }
   0x7   : > { %p129_p3 = scmp.ne.s32.totalorder %s1318_s16, %s1314_s15  ;;  %p130_p4 = scmp.eq.s32.totalorder %s1136_s20, 1 }
   0x8   : > { %s1400_s24 = scalar_select %p111_p1, %s1322_s17, %s113_s22  }
   0x9   : > { %p1402_p5 = por %p124_p2, %p123_p0  ;;  %p1406_p6 = por %p130_p4, %p129_p3 }
   0xa   : > { %p1139_p7 = scmp.ge.s32.totalorder %s1326_s18, 1  ;;  %p165_p8 = scmp.lt.s32.totalorder %s1326_s18, 3 }
   0xc   : > { %p166_p9 = pnand %p1139_p7, %p165_p8 }
   0xd   : > { %p191_p10 = scmp.lt.s32.totalorder (!%p166_p9), %s1385_s19, 1  ;;  %s1328_s6 = smov (!%p166_p9), 127  }
   0xe   : > { %169 = sbr.rel (%p166_p9) target bundleno = 695 (0x2b7), region = 36  ;;  %s1329_s7 = smov (!%p166_p9), 126  }
   0xf   : > { %s1330_s8 = smov (!%p166_p9), 110   ;;  %s1331_s9 = smov (!%p166_p9), 109  }
  0x10   : > { %s1332_s10 = smov (!%p166_p9), 108   ;;  %s1333_s11 = smov (!%p166_p9), 92  }
  0x11   : > { %s1334_s12 = smov (!%p166_p9), 91   ;;  %s1335_s13 = smov (!%p166_p9), 90  }
  0x12   : > { %s188_s29 = sand.u32 (!%p166_p9), 1, %s1318_s16   ;;  %s1284_s22 = scalar_lea.hbm (!%p166_p9), %s1579_s4, 48 }
  0x13   : > { %s192_s27 = scalar_select %p191_p10, %s1385_s19, 1  ;;  %vm222_vm0 = vcmask 1043456   ;;  %vm218_vm1 = vcmask 31744   ;;  %v198_v29 = vld [vmem:[%s1576_s1] sm:$0xff]  ;;  %vm215_vm2 = vcmask 1039360   ;;  %v1141_v31 = vld [vmem:[%s1576_s1 + $0x8] sm:$0xff] }
  0x14   : > { %vm378_vm3 = vcmask 1031168   ;;  %v1154_v36 = vld [vmem:[%s1576_s1 + $0x10] sm:$0xff]  ;;  %vm467_vm4 = vcmask 900096   ;;  %v1161_v46 = vld [vmem:[%s1576_s1 + $0x18] sm:$0xff]  ;;  %vm556_vm5 = vcmask 891904   ;;  %v1168_v52 = vld [vmem:[%s1576_s1 + $0x20] sm:$0xff] }
  0x15   : > { %s1207_s28 = smul.u32 12, %s192_s27  ;;  %vm645_vm6 = vcmask 883712   ;;  %v1175_v57 = vld [vmem:[%s1576_s1 + $0x28] sm:$0xff]  ;;  %vm734_vm7 = vcmask 752640   ;;  %vm823_vm8 = vcmask 744448   ;;  %vm912_vm9 = vcmask 736256  }
  0x16   : > { %vm999_vm10 = vcmask 261120   ;;  %s1206_s30 = smul.u32 24, %s188_s29 }
  0x17   : > { %s195_s5 = scalar_lea.vmem %s1575_s0, %s1207_s28  ;;  %s1337_s28 = smov 1  }
  0x18   : > { %v197_v0 = vld [vmem:[%s195_s5 + $0x8] sm:$0xf]  ;;  %v1417_v1 = vld [vmem:[%s195_s5] sm:$0xff]  ;;  %s1208_s5 = smul.u32 24, %s1385_s19  ;;  %s1061_s19 = scalar_lea.sflag [#allocation3], %s188_s29 }
  0x19   : > { %205 = vst [vmem:[#allocation1 + $0x10] ss:$2 sm:$0xff] %v197_v0 }
  0x1a   : > { %203 = vst [vmem:[#allocation1] ss:$2 sm:$0xff] %v1417_v1 }
  0x20   : > { %v208_v2 = vld.sshfl [vmem:[#allocation1 + $0x10] sm:$0xff pattern:$0x75316420] }
  0x21   : > { %213 = vrot.lane.b32.xlu0 %v208_v2, %s1328_s6  ;;  %291 = vst [vmem:[#allocation1 + $0x10] ss:$2 sm:$0xff] %v197_v0  ;;  %v207_v3 = vld.sshfl [vmem:[#allocation1 + $0x8] sm:$0xff pattern:$0x75316420] }
  0x22   : > { %211 = vrot.lane.b32.xlu1 %v207_v3, %s1328_s6  ;;  %v206_v4 = vld.sshfl [vmem:[#allocation1] sm:$0xff pattern:$0x75316420] }
  0x23   : > { %289 = vst [vmem:[#allocation1] ss:$2 sm:$0xff] %v1417_v1 }
  0x28   : > { %v1421_v5 = vld.sshfl [vmem:[#allocation1 + $0x10] sm:$0xff pattern:$0x75316420] }
  0x29   : > { %209 = vrot.lane.b32.xlu0 %v206_v4, %s1328_s6  ;;  %368 = vst [vmem:[#allocation1 + $0x10] ss:$2 sm:$0xff] %v197_v0 }
  0x2a   : > { %v1423_v6 = vld.sshfl [vmem:[#allocation1] sm:$0xff pattern:$0x75316420]  ;;  %v1425_v7 = vld.sshfl [vmem:[#allocation1 + $0x8] sm:$0xff pattern:$0x75316420] }
  0x2b   : > { %366 = vst [vmem:[#allocation1] ss:$2 sm:$0xff] %v1417_v1  ;;  %1148 = vmatpush.msk.msra.mxu3 %vm222_vm0, %v1423_v6 }
  0x2c   : > { %1149 = vmatmul.msk.f32.vlgmr.msra.gmra.mxu3 %vm218_vm1, %v198_v29 }
  0x30   : > { %v371_v8 = vld.sshfl [vmem:[#allocation1 + $0x10] sm:$0xff pattern:$0x75316420] }
  0x31   : > { %457 = vst [vmem:[#allocation1 + $0x10] ss:$2 sm:$0xff] %v197_v0 }
  0x32   : > { %v369_v9 = vld.sshfl [vmem:[#allocation1] sm:$0xff pattern:$0x75316420]  ;;  %v370_v10 = vld.sshfl [vmem:[#allocation1 + $0x8] sm:$0xff pattern:$0x75316420] }
  0x33   : > { %372 = vrot.lane.b32.xlu1 %v369_v9, %s1329_s7  ;;  %455 = vst [vmem:[#allocation1] ss:$2 sm:$0xff] %v1417_v1  ;;  %374 = vrot.lane.b32.xlu2 %v370_v10, %s1329_s7 }
  0x38   : > { %v460_v11 = vld.sshfl [vmem:[#allocation1 + $0x10] sm:$0xff pattern:$0x75316420] }
  0x39   : > { %546 = vst [vmem:[#allocation1 + $0x10] ss:$2 sm:$0xff] %v197_v0 }
  0x3a   : > { %v459_v12 = vld.sshfl [vmem:[#allocation1 + $0x8] sm:$0xff pattern:$0x75316420]  ;;  %v458_v13 = vld.sshfl [vmem:[#allocation1] sm:$0xff pattern:$0x75316420] }
  0x3b   : > { %465 = vrot.lane.b32.xlu1 %v460_v11, %s1330_s8  ;;  %463 = vrot.lane.b32.xlu0 %v459_v12, %s1330_s8  ;;  %544 = vst [vmem:[#allocation1] ss:$2 sm:$0xff] %v1417_v1  ;;  %v1196_v11 = vld [vmem:[%s1576_s1 + $0x40] sm:$0xff] }
  0x3c   : > { %376 = vrot.lane.b32.xlu2 %v371_v8, %s1329_s7 }
  0x40   : > { %v549_v14 = vld.sshfl [vmem:[#allocation1 + $0x10] sm:$0xff pattern:$0x75316420] }
  0x41   : > { %635 = vst [vmem:[#allocation1 + $0x10] ss:$2 sm:$0xff] %v197_v0 }
  0x42   : > { %v548_v15 = vld.sshfl [vmem:[#allocation1 + $0x8] sm:$0xff pattern:$0x75316420]  ;;  %v547_v16 = vld.sshfl [vmem:[#allocation1] sm:$0xff pattern:$0x75316420] }
  0x43   : > { %554 = vrot.lane.b32.xlu0 %v549_v14, %s1331_s9  ;;  %550 = vrot.lane.b32.xlu1 %v547_v16, %s1331_s9  ;;  %633 = vst [vmem:[#allocation1] ss:$2 sm:$0xff] %v1417_v1 }
  0x44   : > { %461 = vrot.lane.b32.xlu2 %v458_v13, %s1330_s8  ;;  %s1072_s8 = scalar_lea.hbm %s1579_s4, %s1208_s5 }
  0x48   : > { %v638_v17 = vld.sshfl [vmem:[#allocation1 + $0x10] sm:$0xff pattern:$0x75316420] }
  0x49   : > { %724 = vst [vmem:[#allocation1 + $0x10] ss:$2 sm:$0xff] %v197_v0 }
  0x4a   : > { %v637_v18 = vld.sshfl [vmem:[#allocation1 + $0x8] sm:$0xff pattern:$0x75316420]  ;;  %v636_v19 = vld.sshfl [vmem:[#allocation1] sm:$0xff pattern:$0x75316420] }
  0x4b   : > { %641 = vrot.lane.b32.xlu1 %v637_v18, %s1332_s10  ;;  %639 = vrot.lane.b32.xlu0 %v636_v19, %s1332_s10  ;;  %722 = vst [vmem:[#allocation1] ss:$2 sm:$0xff] %v1417_v1 }
  0x4c   : > { %552 = vrot.lane.b32.xlu2 %v548_v15, %s1331_s9  ;;  %s190_s9 = scalar_lea.vmem [#allocation2], %s1206_s30 }
  0x50   : > { %v727_v20 = vld.sshfl [vmem:[#allocation1 + $0x10] sm:$0xff pattern:$0x75316420] }
  0x51   : > { %813 = vst [vmem:[#allocation1 + $0x10] ss:$2 sm:$0xff] %v197_v0 }
  0x52   : > { %v726_v21 = vld.sshfl [vmem:[#allocation1 + $0x8] sm:$0xff pattern:$0x75316420]  ;;  %v725_v22 = vld.sshfl [vmem:[#allocation1] sm:$0xff pattern:$0x75316420] }
  0x53   : > { %643 = vrot.lane.b32.xlu1 %v638_v17, %s1332_s10  ;;  %730 = vrot.lane.b32.xlu0 %v726_v21, %s1333_s11  ;;  %811 = vst [vmem:[#allocation1] ss:$2 sm:$0xff] %v1417_v1  ;;  %s1074_s10 = sshll.u32 %s190_s9, 4  ;;  %s1075_s10 = int_to_ptr.vmem [resolvable:$true] %s1074_s10 }
  0x54   : > { %728 = vrot.lane.b32.xlu2 %v725_v22, %s1333_s11 }
  0x58   : > { %v816_v23 = vld.sshfl [vmem:[#allocation1 + $0x10] sm:$0xff pattern:$0x75316420] }
  0x59   : > { %902 = vst [vmem:[#allocation1 + $0x10] ss:$2 sm:$0xff] %v197_v0 }
  0x5a   : > { %v815_v24 = vld.sshfl [vmem:[#allocation1 + $0x8] sm:$0xff pattern:$0x75316420]  ;;  %v814_v25 = vld.sshfl [vmem:[#allocation1] sm:$0xff pattern:$0x75316420] }
  0x5b   : > { %821 = vrot.lane.b32.xlu1 %v816_v23, %s1334_s12  ;;  %819 = vrot.lane.b32.xlu0 %v815_v24, %s1334_s12  ;;  %900 = vst [vmem:[#allocation1] ss:$2 sm:$0xff] %v1417_v1  ;;  %v1182_v1 = vld [vmem:[%s1576_s1 + $0x30] sm:$0xff] }
  0x5c   : > { %732 = vrot.lane.b32.xlu2 %v727_v20, %s1333_s11  ;;  %s1076_s11 = sshll.u32 %s1072_s8, 4  ;;  %s1077_s11 = int_to_ptr.hbm [resolvable:$true] %s1076_s11 }
  0x60   : > { %v905_v26 = vld.sshfl [vmem:[#allocation1 + $0x10] sm:$0xff pattern:$0x75316420] }
  0x62   : > { %v903_v27 = vld.sshfl [vmem:[#allocation1] sm:$0xff pattern:$0x75316420]  ;;  %v904_v28 = vld.sshfl [vmem:[#allocation1 + $0x8] sm:$0xff pattern:$0x75316420] }
  0x63   : > { %910 = vrot.lane.b32.xlu0 %v905_v26, %s1335_s13  ;;  %906 = vrot.lane.b32.xlu1 %v903_v27, %s1335_s13 }
  0x64   : > { %817 = vrot.lane.b32.xlu2 %v814_v25, %s1334_s12  ;;  %s1278_s12 = sshra.s32 %s1077_s11, 4  ;;  %s1279_s12 = int_to_ptr.hbm [resolvable:$true] %s1278_s12 }
  0x65   : > { %p1285_p0 = scmp.lt.s32.totalorder %s1279_s12, %s1579_s4 }
  0x6c   : > { %908 = vrot.lane.b32.xlu2 %v904_v28, %s1335_s13  ;;  %s1280_s13 = scalar_lea.hbm %s1279_s12, 24 }
  0x6d   : > { %p1281_p11 = scmp.ne.s32.totalorder %s1279_s12, %s1280_s13  ;;  %p1286_p1 = scmp.lt.s32.totalorder %s1284_s22, %s1280_s13 }
  0x6f   : > { %p1282_p12 = pnand %p1281_p11, %p1402_p5  ;;  %p1287_p2 = por %p1286_p1, %p1285_p0 }
  0x71   : > { %p1283_p13 = pneg %p1282_p12 }
  0x73   : > { %p1288_p3 = pnand %p1287_p2, %p1283_p13 }
  0x8d   : > { %v375_v30 = vpop.permute.xlu2 %374 }
  0x93   : > { %v214_v32 = vpop.permute.xlu0 %213 }
  0x94   : > { %v212_v33 = vpop.permute.xlu1 %211  ;;  %1146 = vmatpush.msk.msra.mxu2 %vm222_vm0, %v214_v32 }
  0x95   : > { %v217_v34 = vsel %vm215_vm2, %v212_v33, %v214_v32  ;;  %1147 = vmatmul.msk.f32.vlgmr.msra.gmra.mxu2 %vm218_vm1, %v1141_v31 }
  0x96   : > { %1144 = vmatpush.msk.msra.mxu1 %vm222_vm0, %v217_v34  ;;  %v377_v35 = vpop.permute.xlu2 %376 }
  0x97   : > { %1145 = vmatmul.msk.f32.vlgmr.msra.gmra.mxu1 %vm218_vm1, %v1141_v31  ;;  %v380_v37 = vsel %vm378_vm3, %v375_v30, %v377_v35 }
  0x98   : > { %1157 = vmatpush.msk.msrb.mxu3 %vm222_vm0, %v380_v37  ;;  %1152 = vmatpush.msk.msrb.mxu1 %vm222_vm0, %v1421_v5  ;;  %v1189_v5 = vld [vmem:[%s1576_s1 + $0x38] sm:$0xff] }
  0x99   : > { %1158 = vmatmul.msk.f32.vlgmr.msrb.gmra.mxu3 %vm218_vm1, %v1154_v36 }
  0x9b   : > { %v210_v38 = vpop.permute.xlu0 %209 }
  0x9c   : > { %v216_v39 = vsel %vm215_vm2, %v210_v38, %v212_v33 }
  0x9d   : > { %1142 = vmatpush.msk.msra.mxu0 %vm222_vm0, %v216_v39 }
  0x9e   : > { %1143 = vmatmul.msk.f32.vlgmr.msra.gmra.mxu0 %vm218_vm1, %v1141_v31  ;;  %v462_v40 = vpop.permute.xlu2 %461 }
  0x9f   : > { %1150 = vmatpush.msk.msrb.mxu0 %vm222_vm0, %v1425_v7  ;;  %1153 = vmatmul.msk.f32.vlgmr.msrb.gmra.mxu1 %vm218_vm1, %v198_v29 }
  0xa1   : > { %1159 = vmatpush.msk.msra.mxu0 %vm222_vm0, %v377_v35 }
  0xa5   : > { %v373_v41 = vpop.permute.xlu1 %372 }
  0xa6   : > { %v379_v42 = vsel %vm378_vm3, %v373_v41, %v375_v30  ;;  %1151 = vmatmul.msk.f32.vlgmr.msrb.gmra.mxu0 %vm218_vm1, %v198_v29  ;;  %v553_v43 = vpop.permute.xlu2 %552 }
  0xa7   : > { %1155 = vmatpush.msk.msrb.mxu2 %vm222_vm0, %v379_v42 }
  0xa8   : > { %1156 = vmatmul.msk.f32.vlgmr.msrb.gmra.mxu2 %vm218_vm1, %v1154_v36 }
  0xad   : > { %v466_v44 = vpop.permute.xlu1 %465  ;;  %v464_v45 = vpop.permute.xlu0 %463 }
  0xae   : > { %v469_v47 = vsel %vm467_vm4, %v464_v45, %v466_v44  ;;  %v468_v48 = vsel %vm467_vm4, %v462_v40, %v464_v45  ;;  %1166 = vmatpush.msk.msra.mxu3 %vm222_vm0, %v466_v44  ;;  %1160 = vmatmul.msk.f32.vlgmr.msra.gmra.mxu0 %vm218_vm1, %v1154_v36  ;;  %v729_v49 = vpop.permute.xlu2 %728 }
  0xaf   : > { %1162 = vmatpush.msk.msra.mxu1 %vm222_vm0, %v468_v48  ;;  %1164 = vmatpush.msk.msra.mxu2 %vm222_vm0, %v469_v47  ;;  %v321_v17 = vpop.f32.mrf.mxu3 }
  0xb0   : > { %1165 = vmatmul.msk.f32.vlgmr.msra.gmra.mxu2 %vm218_vm1, %v1161_v46  ;;  %1163 = vmatmul.msk.f32.vlgmr.msra.gmra.mxu1 %vm218_vm1, %v1161_v46 }
  0xb1   : > { %1167 = vmatmul.msk.f32.vlgmr.msra.gmra.mxu3 %vm218_vm1, %v1161_v46 }
  0xb5   : > { %v555_v50 = vpop.permute.xlu0 %554  ;;  %v551_v51 = vpop.permute.xlu1 %550 }
  0xb6   : > { %v558_v53 = vsel %vm556_vm5, %v553_v43, %v555_v50  ;;  %v557_v54 = vsel %vm556_vm5, %v551_v51, %v553_v43  ;;  %1173 = vmatpush.msk.msrb.mxu2 %vm222_vm0, %v555_v50  ;;  %v733_v59 = vpop.permute.xlu2 %732 }
  0xb7   : > { %1169 = vmatpush.msk.msrb.mxu0 %vm222_vm0, %v557_v54  ;;  %1171 = vmatpush.msk.msrb.mxu1 %vm222_vm0, %v558_v53 }
  0xb8   : > { %1174 = vmatmul.msk.f32.vlgmr.msrb.gmra.mxu2 %vm218_vm1, %v1168_v52  ;;  %1170 = vmatmul.msk.f32.vlgmr.msrb.gmra.mxu0 %vm218_vm1, %v1168_v52 }
  0xb9   : > { %1172 = vmatmul.msk.f32.vlgmr.msrb.gmra.mxu1 %vm218_vm1, %v1168_v52 }
  0xbd   : > { %v642_v55 = vpop.permute.xlu1 %641  ;;  %v640_v56 = vpop.permute.xlu0 %639 }
  0xbe   : > { %v646_v58 = vsel %vm645_vm6, %v640_v56, %v642_v55  ;;  %v818_v2 = vpop.permute.xlu2 %817 }
  0xbf   : > { %1176 = vmatpush.msk.msrb.mxu3 %vm222_vm0, %v646_v58 }
  0xc0   : > { %1177 = vmatmul.msk.f32.vlgmr.msrb.gmra.mxu3 %vm218_vm1, %v1175_v57 }
  0xc5   : > { %v644_v60 = vpop.permute.xlu1 %643  ;;  %v731_v61 = vpop.permute.xlu0 %730 }
  0xc6   : > { %v647_v62 = vsel %vm645_vm6, %v642_v55, %v644_v60  ;;  %v735_v63 = vsel %vm734_vm7, %v729_v49, %v731_v61  ;;  %v736_v0 = vsel %vm734_vm7, %v731_v61, %v733_v59  ;;  %1180 = vmatpush.msk.msra.mxu1 %vm222_vm0, %v644_v60  ;;  %v909_v8 = vpop.permute.xlu2 %908  ;;  %v987_v55 = vld [vmem:[%s1578_s3] sm:$0x7] }
  0xc7   : > { %1178 = vmatpush.msk.msra.mxu0 %vm222_vm0, %v647_v62  ;;  %1181 = vmatmul.msk.f32.vlgmr.msra.gmra.mxu1 %vm218_vm1, %v1175_v57  ;;  %v989_v62 = vperm.slane %v987_v55, 0 }
  0xc8   : > { %1183 = vmatpush.msk.msra.mxu2 %vm222_vm0, %v735_v63  ;;  %1185 = vmatpush.msk.msra.mxu3 %vm222_vm0, %v736_v0  ;;  %v990_v63 = vperm.slane %v987_v55, 1 }
  0xc9   : > { %1179 = vmatmul.msk.f32.vlgmr.msra.gmra.mxu0 %vm218_vm1, %v1175_v57  ;;  %1184 = vmatmul.msk.f32.vlgmr.msra.gmra.mxu2 %vm218_vm1, %v1182_v1 }
  0xca   : > { %1186 = vmatmul.msk.f32.vlgmr.msra.gmra.mxu3 %vm218_vm1, %v1182_v1  ;;  %1187 = vmatpush.msk.msrb.mxu0 %vm222_vm0, %v733_v59 }
  0xcd   : > { %v822_v3 = vpop.permute.xlu1 %821  ;;  %v820_v4 = vpop.permute.xlu0 %819 }
  0xce   : > { %v825_v6 = vsel %vm823_vm8, %v820_v4, %v822_v3  ;;  %v824_v7 = vsel %vm823_vm8, %v818_v2, %v820_v4  ;;  %1194 = vmatpush.msk.msrb.mxu3 %vm222_vm0, %v822_v3  ;;  %v991_v4 = vperm.slane %v987_v55, 2 }
  0xcf   : > { %1190 = vmatpush.msk.msrb.mxu1 %vm222_vm0, %v824_v7  ;;  %1192 = vmatpush.msk.msrb.mxu2 %vm222_vm0, %v825_v6 }
  0xd0   : > { %1191 = vmatmul.msk.f32.vlgmr.msrb.gmra.mxu1 %vm218_vm1, %v1189_v5 }
  0xd1   : > { %1188 = vmatmul.msk.f32.vlgmr.msrb.gmra.mxu0 %vm218_vm1, %v1182_v1  ;;  %1193 = vmatmul.msk.f32.vlgmr.msrb.gmra.mxu2 %vm218_vm1, %v1189_v5 }
  0xd2   : > { %1195 = vmatmul.msk.f32.vlgmr.msrb.gmra.mxu3 %vm218_vm1, %v1189_v5 }
  0xd5   : > { %v911_v9 = vpop.permute.xlu0 %910  ;;  %v907_v10 = vpop.permute.xlu1 %906 }
  0xd6   : > { %v914_v12 = vsel %vm912_vm9, %v909_v8, %v911_v9  ;;  %v913_v13 = vsel %vm912_vm9, %v907_v10, %v909_v8  ;;  %1201 = vmatpush.msk.msra.mxu2 %vm222_vm0, %v911_v9 }
  0xd7   : > { %1197 = vmatpush.msk.msra.mxu0 %vm222_vm0, %v913_v13  ;;  %1199 = vmatpush.msk.msra.mxu1 %vm222_vm0, %v914_v12 }
  0xd8   : > { %1200 = vmatmul.msk.f32.vlgmr.msra.gmra.mxu1 %vm218_vm1, %v1196_v11 }
  0xd9   : > { %1198 = vmatmul.msk.f32.vlgmr.msra.gmra.mxu0 %vm218_vm1, %v1196_v11  ;;  %1202 = vmatmul.msk.f32.vlgmr.msra.gmra.mxu2 %vm218_vm1, %v1196_v11 }
 0x114   : > { %v266_v14 = vpop.f32.mrf.mxu1 }
 0x118   : > { %v286_v16 = vpop.f32.mrf.mxu2 }
 0x11b   : > { %v246_v15 = vpop.f32.mrf.mxu0 }
 0x11c   : > { %v361_v18 = vpop.f32.mrf.mxu1  ;;  %v427_v21 = vpop.f32.mrf.mxu3  ;;  %v322_v28 = vadd.f32 %v321_v17, %v246_v15 }
 0x11d   : > { %v362_v39 = vadd.f32 %v361_v18, %v286_v16 }
 0x123   : > { %v341_v19 = vpop.f32.mrf.mxu0 }
 0x124   : > { %v342_v32 = vadd.f32 %v341_v19, %v266_v14 }
 0x126   : > { %v451_v35 = vadd.f32 %v427_v21, %v342_v32  ;;  %v1336_v21 = vmov 0  }
 0x127   : > { %1259 = vset.pattern.permute.xlu2 %v1336_v21 }
 0x12b   : > { %v407_v20 = vpop.f32.mrf.mxu2  ;;  %v447_v23 = vpop.f32.mrf.mxu0 }
 0x12c   : > { %v450_v34 = vadd.f32 %v407_v20, %v322_v28  ;;  %v452_v46 = vadd.f32 %v447_v23, %v362_v39 }
 0x12d   : > { %v496_v22 = vpop.f32.mrf.mxu1 }
 0x12e   : > { %v539_v36 = vadd.f32 %v496_v22, %v450_v34 }
 0x133   : > { %v516_v24 = vpop.f32.mrf.mxu2 }
 0x134   : > { %v536_v25 = vpop.f32.mrf.mxu3  ;;  %v540_v37 = vadd.f32 %v516_v24, %v451_v35 }
 0x135   : > { %v585_v27 = vpop.f32.mrf.mxu0  ;;  %v541_v49 = vadd.f32 %v536_v25, %v452_v46 }
 0x136   : > { %v605_v26 = vpop.f32.mrf.mxu1  ;;  %v628_v40 = vadd.f32 %v585_v27, %v539_v36 }
 0x137   : > { %v629_v44 = vadd.f32 %v605_v26, %v540_v37 }
 0x13b   : > { %v625_v29 = vpop.f32.mrf.mxu2 }
 0x13c   : > { %v630_v52 = vadd.f32 %v625_v29, %v541_v49 }
 0x143   : > { %v674_v30 = vpop.f32.mrf.mxu3 }
 0x144   : > { %v714_v31 = vpop.f32.mrf.mxu1  ;;  %v717_v45 = vadd.f32 %v674_v30, %v628_v40 }
 0x145   : > { %v719_v58 = vadd.f32 %v714_v31, %v630_v52 }
 0x146   : > { %v694_v33 = vpop.f32.mrf.mxu0 }
 0x147   : > { %v718_v47 = vadd.f32 %v694_v33, %v629_v44  ;;  %v1019_v33 = vld [vmem:[%s1577_s2] sm:$0xff] }
 0x14c   : > { %v763_v38 = vpop.f32.mrf.mxu2 }
 0x14d   : > { %v852_v41 = vpop.f32.mrf.mxu1  ;;  %v783_v42 = vpop.f32.mrf.mxu3  ;;  %v806_v48 = vadd.f32 %v763_v38, %v717_v45  ;;  %v1338_v38 = vmov 1  }
 0x14e   : > { %v803_v43 = vpop.f32.mrf.mxu0  ;;  %v807_v50 = vadd.f32 %v783_v42, %v718_v47  ;;  %1261 = vset.pattern.permute.xlu0 %v1338_v38 }
 0x14f   : > { %v895_v53 = vadd.f32 %v852_v41, %v806_v48  ;;  %v808_v0 = vadd.f32 %v803_v43, %v719_v58 }
 0x154   : > { %v872_v51 = vpop.f32.mrf.mxu2 }
 0x155   : > { %v896_v54 = vadd.f32 %v872_v51, %v807_v50  ;;  %v961_v56 = vpop.f32.mrf.mxu1  ;;  %v892_v61 = vpop.f32.mrf.mxu3 }
 0x156   : > { %v941_v57 = vpop.f32.mrf.mxu0  ;;  %v897_v3 = vadd.f32 %v892_v61, %v808_v0 }
 0x157   : > { %v1525_v59 = vadd.f32 %v941_v57, %v895_v53  ;;  %v1527_v60 = vadd.f32 %v961_v56, %v896_v54 }
 0x159   : > { %v1005_v1 = vmul.f32 %v1525_v59, %v1525_v59  ;;  %v1006_v2 = vmul.f32 %v1527_v60, %v1527_v60  ;;  %v995_v5 = vmul.f32 %v989_v62, %v1525_v59  ;;  %v996_v6 = vmul.f32 %v990_v63, %v1527_v60 }
 0x15b   : > { %v1008_v9 = vmul.f32 %v1005_v1, %v989_v62  ;;  %v1009_v10 = vmul.f32 %v1006_v2, %v990_v63  ;;  %v998_v13 = vadd.f32 %v996_v6, %v995_v5 }
 0x15c   : > { %v981_v7 = vpop.f32.mrf.mxu2 }
 0x15d   : > { %v986_v8 = vadd.f32 %v981_v7, %v897_v3  ;;  %v1011_v17 = vadd.f32 %v1009_v10, %v1008_v9 }
 0x15f   : > { %v1007_v11 = vmul.f32 %v986_v8, %v986_v8  ;;  %v997_v12 = vmul.f32 %v991_v4, %v986_v8 }
 0x161   : > { %v1000_v14 = vsel %vm999_vm10, %v997_v12, 0.0  ;;  %v1010_v15 = vmul.f32 %v1007_v11, %v991_v4 }
 0x162   : > { %v1001_v16 = vadd.f32 %v1000_v14, %v998_v13 }
 0x163   : > { %v1012_v18 = vsel %vm999_vm10, %v1010_v15, 0.0 }
 0x164   : > { %1002 = vadd.xlane.f32.xlu0 %v1001_v16  ;;  %v1013_v19 = vadd.f32 %v1012_v18, %v1011_v17 }
 0x166   : > { %1014 = vadd.xlane.f32.xlu1 %v1013_v19 }
 0x1d7   : > { %v1003_v20 = vpop.xlane.xlu0 %1002 }
 0x1d8   : > { %v1004_v22 = vmul.f32 0.00390625, %v1003_v20 }
 0x1d9   : > { %v1015_v23 = vpop.xlane.xlu1 %1014 }
 0x1da   : > { %v1017_v24 = vmul.f32 %v1004_v22, %v1004_v22  ;;  %v1016_v25 = vmul.f32 0.00390625, %v1015_v23 }
 0x1dc   : > { %v1018_v26 = vsub.f32 %v1016_v25, %v1017_v24 }
 0x1de   : > { %v1020_v27 = vadd.f32 1e-05, %v1018_v26 }
 0x1e0   : > { %1262 = vrsqrt.f32 %v1020_v27  ;;  %vm1027_vm12 = vweird.f32 %v1020_v27 }
 0x1e6   : > { %v1263_v28 = vpop.eup %1262 }
 0x1e7   : > { %v1022_v29 = vmul.f32 %v1263_v28, %v1020_v27  ;;  %vm1028_vm11 = vweird.f32 %v1263_v28 }
 0x1e8   : > { %vm1029_vm13 = vmor %vm1027_vm12, %vm1028_vm11 }
 0x1e9   : > { %v1023_v30 = vmul.f32 %v1263_v28, %v1022_v29 }
 0x1eb   : > { %v1024_v31 = vmul.f32 0.5, %v1023_v30 }
 0x1ed   : > { %v1025_v32 = vsub.f32 1.5, %v1024_v31 }
 0x1ef   : > { %v1026_v34 = vmul.f32 %v1263_v28, %v1025_v32 }
 0x1f1   : > { %v1030_v35 = vsel %vm1029_vm13, %v1263_v28, %v1026_v34 }
 0x1f2   : > { %v1031_v36 = vmul.f32 %v1030_v35, %v1019_v33 }
 0x1f4   : > { %v1032_v37 = vmul.f32 %v1031_v36, %v1004_v22 }
 0x1f6   : > { %1034 = vrot.lane.b32.xlu2 %v1032_v37, %s1337_s28 }
 0x1fe   : > { %1040 = vperm.xlu2 %1259, %v1031_v36  }
 0x206   : > { %1260 = vset.pattern.permute.xlu2 %v1338_v38 }
 0x250   : > { %v1035_v39 = vpop.permute.xlu2 %1034 }
 0x251   : > { %v1037_v40 = vsub.f32 %v1019_v33, %v1035_v39 }
 0x253   : > { %1048 = vperm.xlu2 %1260, %v1037_v40  }
 0x258   : > { %v1041_v41 = vpop.permute.xlu2 %1040 }
 0x259   : > { %v1043_v42 = vmul.f32 %v1041_v41, %v1525_v59  ;;  %v1044_v43 = vmul.f32 %v1041_v41, %v1527_v60  ;;  %v1045_v44 = vmul.f32 %v1041_v41, %v986_v8 }
 0x2ad   : > { %v1049_v45 = vpop.permute.xlu2 %1048 }
 0x2ae   : > { %v1051_v46 = vadd.f32 %v1049_v45, %v1043_v42  ;;  %v1052_v47 = vadd.f32 %v1049_v45, %v1044_v43  ;;  %v1053_v48 = vadd.f32 %v1049_v45, %v1045_v44 }
 0x2b0   : > { %v1054_v49 = vmax.f32 %v1051_v46, 0.0  ;;  %v1055_v50 = vmax.f32 %v1052_v47, 0.0  ;;  %v1056_v51 = vmax.f32 %v1053_v48, 0.0 }
 0x2b2   : > { %1057 = vst [vmem:[%s190_s9] sm:$0xff] %v1054_v49 }
 0x2b3   : > { %1058 = vst [vmem:[%s190_s9 + $0x8] sm:$0xff] %v1055_v50 }
 0x2b4   : > { %1059 = vst.msk [vmem:[%s190_s9 + $0x10] sm:$0xff] %vm999_vm10, %v1056_v51 }
 0x2b5   : > { %1291 = shalt.err (!%p1288_p3)
}
 0x2b6   : > { %1209 = dma.vmem_to_hbm [thread:$0]  (%p1402_p5), %s1075_s10, 384, %s1077_s11, %s1061_s19  }
 0x2b7 PF: > { %p1215_p4 = scmp.ge.s32.totalorder %s1326_s18, 2  ;;  %s1088_s28 = sand.u32 1, %s1314_s15  }
 0x2b8   : > { %s1089_s29 = scalar_lea.sflag [#allocation3], %s1088_s28 }
 0x2b9   : > { %p1212_p7 = pnand %p1215_p4, %p1406_p6 }
 0x2bb   : > { %p1213_p8 = pneg %p1212_p7 }
 0x2bd   : > { %1309 = dma.done.wait (%p1213_p8), %s1089_s29, 384  }
 0x2be   : > { %1311 = vsyncadd (%p1213_p8), %s1089_s29, 4294966912  ;;  %p14_p9 = scmp.ge.s32.totalorder %s1389_s21, 4   ;;  %s1582_s15 = smov %s1318_s16 }
 0x2bf   : > { %s1583_s16 = smov %s1322_s17  ;;  %s1584_s17 = smov %s1400_s24 }
 0x2c0   : > { %s1585_s18 = smov %s1389_s21  ;;  %16 = sbr.rel (!%p14_p9) target bundleno = 3 (0x3), region = 88 }
 0x2c5   :  { %1095 = vsyncpa [#allocation3], 1 }
 0x2c6   :  { %1097 = vsyncpa [#allocation3 + $0x1], 1 }

</bundles_post_ra>
